<compile_context>
chip_gen: v5e
topology: v5e:2x2
jax: 0.10.0
libtpu: 0.0.40
codegen_flags: <defaults>
</compile_context>

<pallas_src>
import functools

import jax
import jax.numpy as jnp
from jax import lax
from jax.experimental import pallas as pl
from jax.experimental.pallas import tpu as pltpu


def _round_up(v, m):
    return (v + m - 1) // m * m


def _pad_dim(d):
    # Lane-dense padding; 256-aligned when the dim is large enough so v6e/v7x
    # (2x256x256 MXU) tiles are never 384-wide. v5e (4x128x128) is fine either way.
    return 128 if d <= 128 else _round_up(d, 256)


def _vmem_capacity_bytes():
    try:
        return int(pltpu.get_tpu_info().vmem_capacity_bytes)
    except Exception:
        return 64 * 1024 * 1024  # v7x per-TensorCore size (smallest) — safe default


def mlp_block_kernel(x_ref, xsum_ref, w_ref, b_ref, g_ref, be_ref, o_ref,
                     mean_acc_ref, *maybe_acc, eps, inv_batch):
    """One (j, k) grid step of: y = x @ W^T + b; BatchNorm1d(train); ReLU; Dropout(0)."""
    k = pl.program_id(1)
    # For f32 outputs the output block (resident across k: its index_map only depends
    # on j) doubles as the f32 accumulator; otherwise a dedicated VMEM scratch is used.
    acc_ref = maybe_acc[0] if maybe_acc else o_ref

    @pl.when(k == 0)
    def _():
        acc_ref[...] = jnp.zeros_like(acc_ref)
        mean_acc_ref[...] = jnp.zeros_like(mean_acc_ref)

    x_blk = x_ref[...]                                   # (B, tk)
    w_blk = w_ref[...]                                   # (tk, tn), pre-transposed W

    # Main matmul: plain ((1,),(0,)) contraction, f32 accumulation on the MXU.
    acc_ref[...] += jnp.dot(x_blk, w_blk, preferred_element_type=jnp.float32)

    # Fold sum_b(y) into the MXU K loop: sum_b(x @ W) = (sum_b x) @ W, a tiny
    # (1, tk) @ (tk, tn) product — removes one full (B, tn) reduction from the epilogue.
    mean_acc_ref[...] += jnp.dot(xsum_ref[...].astype(w_blk.dtype), w_blk,
                                 preferred_element_type=jnp.float32)

    @pl.when(k == pl.num_programs(1) - 1)
    def _():
        bias = b_ref[...].astype(jnp.float32)            # (1, tn)
        y = acc_ref[...] + bias                          # (B, tn)

        # BatchNorm1d, training mode: per-feature batch mean and *biased* variance
        # (matches PyTorch's forward normalization in .train()).
        mean = mean_acc_ref[...] * inv_batch + bias      # (1, tn)
        d = y - mean                                     # centered: no E[y^2]-mean^2 cancellation
        var = jnp.sum(d * d, axis=0, keepdims=True) * inv_batch
        y_hat = d * lax.rsqrt(var + eps)

        out = (g_ref[...].astype(jnp.float32) * y_hat
               + be_ref[...].astype(jnp.float32))

        # ReLU
        out = jnp.maximum(out, 0.0)

        # Dropout(p=0.0) is the identity.
        # TODO(synk): for dropout p > 0 in training mode, draw a Bernoulli mask via
        # pltpu.prng_seed / pltpu.stateful_bernoulli and scale by 1/(1-p).
        o_ref[...] = out.astype(o_ref.dtype)


def prepare_mlp_block_params(weight, bias, gamma, beta, *, matmul_dtype=None):
    """One-time parameter preparation — hoist OUTSIDE the per-step jit.

    Zero-pads the feature dims to lane/MXU-friendly sizes and pre-transposes the
    weight to (Din_p, Dout_p) so the kernel's contraction is a plain ((1,),(0,)) dot.
    """
    Dout, Din = weight.shape
    Din_p, Dout_p = _pad_dim(Din), _pad_dim(Dout)
    w = weight.astype(matmul_dtype) if matmul_dtype is not None else weight
    w_t = jnp.pad(w, ((0, Dout_p - Dout), (0, Din_p - Din))).T        # (Din_p, Dout_p)
    pad_o = (0, Dout_p - Dout)
    return dict(
        w_t=w_t,
        bias=jnp.pad(bias, pad_o).reshape(1, Dout_p),
        gamma=jnp.pad(gamma, pad_o).reshape(1, Dout_p),
        beta=jnp.pad(beta, pad_o).reshape(1, Dout_p),
        din=Din,
        dout=Dout,
    )


def _choose_config(B, Din_p, Dout_p, x_isz, w_isz, o_isz, out_is_f32, budget):
    """Pick (tn, tk) tiles from the VMEM budget. tk == Din_p keeps x resident."""
    def cands(dim_p):
        c = [t for t in (512, 256, 128) if dim_p % t == 0]
        return c or [dim_p]

    tn_cands = cands(Dout_p)
    # Prefer >= 2 output tiles on the "parallel" j axis (v7x has 2 TensorCores; no-op
    # on single-core v5e/v6e) without dropping below 256-wide MXU N tiles.
    tn_pref = tn_cands[0]
    for t in tn_cands:
        if Dout_p // t >= 2 and t >= 256:
            tn_pref = t
            break
    tn_cands = [t for t in tn_cands if t <= tn_pref]

    tk_cands = sorted(set(cands(Din_p) + [Din_p]), reverse=True)

    def vmem_need(tn, tk):
        x_b = 2 * B * tk * x_isz                       # double-buffered x block
        w_b = 2 * tk * tn * w_isz                      # double-buffered weight block
        o_b = 2 * B * tn * o_isz                       # double-buffered output block
        acc_b = 0 if out_is_f32 else B * tn * 4        # f32 scratch only if out != f32
        small = 2 * tk * 4 + 3 * 2 * tn * 4 + tn * 4   # sum_b(x), b/gamma/beta, mean scratch
        return x_b + w_b + o_b + acc_b + small

    # Preference: keep x resident (tk == Din_p → x read from HBM exactly once), then
    # the biggest tiles.  Streamed-x fallback re-reads each x tile Dout_p // tn times.
    choices = [(tn, tk) for tn in tn_cands for tk in tk_cands]
    choices.sort(key=lambda c: (c[1] != Din_p, -c[0], -c[1]))
    for tn, tk in choices:
        need = vmem_need(tn, tk)
        if need <= budget:
            return tn, tk, need
    tn, tk = choices[-1]
    return tn, tk, vmem_need(tn, tk)


def mlp_block(x, params, *, eps=1e-5, matmul_dtype=None):
    """x: (B, Din); params from prepare_mlp_block_params. Returns (B, Dout)."""
    B, Din = x.shape
    w_t = params["w_t"]
    Din_p, Dout_p = w_t.shape
    Dout = params["dout"]
    assert Din == params["din"], "x feature dim does not match prepared params"

    mm_dtype = matmul_dtype if matmul_dtype is not None else w_t.dtype
    x_mm = x if x.dtype == mm_dtype else x.astype(mm_dtype)
    if Din_p != Din:
        # TODO(synk): keep Din % 128 == 0 (or pre-pad x upstream) in production — this
        # pad is an extra HBM pass over x every call.
        x_mm = jnp.pad(x_mm, ((0, 0), (0, Din_p - Din)))

    # Per-feature batch sum of x (one cheap pass) so the kernel can build sum_b(y) on
    # the MXU during the K loop instead of an extra (B, tn) reduction in the epilogue.
    x_sum = jnp.sum(x_mm.astype(jnp.float32), axis=0, keepdims=True)   # (1, Din_p)

    out_dtype = x.dtype
    out_is_f32 = jnp.dtype(out_dtype) == jnp.float32

    capacity = _vmem_capacity_bytes()
    budget = int(capacity * 0.75)                       # headroom for Mosaic internals
    tn, tk, need = _choose_config(
        B, Din_p, Dout_p, x_mm.dtype.itemsize, w_t.dtype.itemsize,
        jnp.dtype(out_dtype).itemsize, out_is_f32, budget)
    vmem_limit = min(capacity, max(budget, need + (4 << 20)))

    n_j = Dout_p // tn
    n_k = Din_p // tk
    x_resident = (tk == Din_p)                          # x block index constant → 1 HBM read

    kernel = functools.partial(mlp_block_kernel, eps=float(eps),
                               inv_batch=float(1.0 / B))

    scratch_shapes = [pltpu.VMEM((1, tn), jnp.float32)]            # sum_b(x) @ W accumulator
    if not out_is_f32:
        scratch_shapes.append(pltpu.VMEM((B, tn), jnp.float32))    # f32 matmul accumulator

    cost = pl.CostEstimate(
        flops=2 * B * Din_p * Dout_p + 2 * Din_p * Dout_p,
        transcendentals=Dout_p,                                    # rsqrt per feature
        bytes_accessed=(B * Din_p * x_mm.dtype.itemsize * (1 if x_resident else n_j)
                        + Din_p * Dout_p * w_t.dtype.itemsize
                        + B * Dout_p * jnp.dtype(out_dtype).itemsize
                        + (2 * Din_p + 3 * Dout_p) * 4),
    )

    out = pl.pallas_call(
        kernel,
        out_shape=jax.ShapeDtypeStruct((B, Dout_p), out_dtype),
        grid_spec=pltpu.PrefetchScalarGridSpec(
            num_scalar_prefetch=0,
            grid=(n_j, n_k),
            in_specs=[
                # When tk == Din_p this block index is constant → x stays resident in
                # VMEM and is DMA'd from HBM once per call; otherwise x tiles are
                # re-streamed once per output tile (Dout_p // tn times).
                pl.BlockSpec((B, tk), lambda j, k: (0, k)),        # x
                pl.BlockSpec((1, tk), lambda j, k: (0, k)),        # sum_b(x)
                # Deepen with pipeline_mode=pl.Buffered(3) only if xprof shows exposed
                # weight DMA at small B.
                pl.BlockSpec((tk, tn), lambda j, k: (k, j)),       # weight^T (Din_p, Dout_p)
                pl.BlockSpec((1, tn), lambda j, k: (0, j)),        # bias
                pl.BlockSpec((1, tn), lambda j, k: (0, j)),        # gamma
                pl.BlockSpec((1, tn), lambda j, k: (0, j)),        # beta
            ],
            out_specs=pl.BlockSpec((B, tn), lambda j, k: (0, j)),
            scratch_shapes=scratch_shapes,
        ),
        compiler_params=pltpu.CompilerParams(
            dimension_semantics=("parallel", "arbitrary"),
            vmem_limit_bytes=int(vmem_limit),
        ),
        cost_estimate=cost,
    )(x_mm, x_sum, w_t, params["bias"], params["gamma"], params["beta"])

    if Dout_p != Dout:
        out = out[:, :Dout]
    return out


def reference_mlp_block(x, weight, bias, gamma, beta, eps=1e-5):
    y = x @ weight.T + bias
    mean = jnp.mean(y, axis=0, keepdims=True)
    var = jnp.mean((y - mean) ** 2, axis=0, keepdims=True)
    y_hat = (y - mean) / jnp.sqrt(var + eps)
    return jnp.maximum(gamma * y_hat + beta, 0.0)


if __name__ == "__main__":
    B, Din, Dout = 16, 48, 80

    key = jax.random.PRNGKey(0)
    kx, kw, kb = jax.random.split(key, 3)

    x = jax.random.normal(kx, (B, Din), dtype=jnp.float32)

    # PyTorch nn.Linear default init: U(-1/sqrt(Din), 1/sqrt(Din)).
    bound = 1.0 / (Din ** 0.5)
    weight = jax.random.uniform(kw, (Dout, Din), minval=-bound, maxval=bound,
                                dtype=jnp.float32)
    bias = jax.random.uniform(kb, (Dout,), minval=-bound, maxval=bound,
                              dtype=jnp.float32)
    # BatchNorm1d default init: gamma = 1, beta = 0.
    gamma = jnp.ones((Dout,), dtype=jnp.float32)
    beta = jnp.zeros((Dout,), dtype=jnp.float32)

    # One-time parameter prep (padding + weight transpose) hoisted out of the call.
    params = prepare_mlp_block_params(weight, bias, gamma, beta)

    out = mlp_block(x, params)
    out = jax.block_until_ready(out)

    ref = reference_mlp_block(x, weight, bias, gamma, beta)
    assert out.shape == (B, Dout)
    assert jnp.allclose(out, ref, atol=1e-4, rtol=1e-4), "mismatch vs reference"

    print("KERNEL_OK")
</pallas_src>

<mosaic_0001>
module attributes {stable_mosaic.version = 11 : i64} {
  func.func @mlp_block_kernel(%arg0: i32, %arg1: i32, %arg2: memref<16x128xf32, #tpu.memory_space<vmem>>, %arg3: memref<1x128xf32, #tpu.memory_space<vmem>>, %arg4: memref<128x128xf32, #tpu.memory_space<vmem>>, %arg5: memref<1x128xf32, #tpu.memory_space<vmem>>, %arg6: memref<1x128xf32, #tpu.memory_space<vmem>>, %arg7: memref<1x128xf32, #tpu.memory_space<vmem>>, %arg8: memref<16x128xf32, #tpu.memory_space<vmem>>, %arg9: memref<1x128xf32, #tpu.memory_space<vmem>>) attributes {dimension_semantics = [#tpu.dimension_semantics<parallel>, #tpu.dimension_semantics<arbitrary>], iteration_bounds = array<i64: 1, 1>, scalar_prefetch = 0 : i64, scratch_operands = 1 : i64, tpu.core_type = #tpu.core_type<tc>, window_params = [{transform_indices = @transform_0, window_bounds = array<i64: 16, 128>}, {transform_indices = @transform_1, window_bounds = array<i64: 1, 128>}, {transform_indices = @transform_2, window_bounds = array<i64: 128, 128>}, {transform_indices = @transform_3, window_bounds = array<i64: 1, 128>}, {transform_indices = @transform_4, window_bounds = array<i64: 1, 128>}, {transform_indices = @transform_5, window_bounds = array<i64: 1, 128>}, {transform_indices = @transform_6, window_bounds = array<i64: 16, 128>}]} {
    %c0_i32 = arith.constant 0 : i32
    %0 = arith.cmpi eq, %arg1, %c0_i32 : i32
    %1 = arith.extui %0 : i1 to i32
    %c0_i32_0 = arith.constant 0 : i32
    %2 = arith.cmpi ne, %1, %c0_i32_0 : i32
    scf.if %2 {
      %cst_17 = arith.constant 0.000000e+00 : f32
      %17 = vector.broadcast %cst_17 : f32 to vector<16x128xf32>
      %c0_18 = arith.constant 0 : index
      %c0_19 = arith.constant 0 : index
      %18 = vector.load %arg8[%c0_18, %c0_19] : memref<16x128xf32, #tpu.memory_space<vmem>>, vector<16x128xf32>
      tpu.vector_store %arg8[%c0_18, %c0_19], %17 {strides = array<i32>} : memref<16x128xf32, #tpu.memory_space<vmem>>, vector<16x128xf32>,
      %cst_20 = arith.constant 0.000000e+00 : f32
      %19 = vector.broadcast %cst_20 : f32 to vector<1x128xf32>
      %c0_21 = arith.constant 0 : index
      %c0_22 = arith.constant 0 : index
      %20 = vector.load %arg9[%c0_21, %c0_22] : memref<1x128xf32, #tpu.memory_space<vmem>>, vector<1x128xf32>
      tpu.vector_store %arg9[%c0_21, %c0_22], %19 {strides = array<i32>} : memref<1x128xf32, #tpu.memory_space<vmem>>, vector<1x128xf32>,
    } else {
    }
    %c0 = arith.constant 0 : index
    %c0_1 = arith.constant 0 : index
    %3 = vector.load %arg2[%c0, %c0_1] : memref<16x128xf32, #tpu.memory_space<vmem>>, vector<16x128xf32>
    %c0_2 = arith.constant 0 : index
    %c0_3 = arith.constant 0 : index
    %4 = vector.load %arg4[%c0_2, %c0_3] : memref<128x128xf32, #tpu.memory_space<vmem>>, vector<128x128xf32>
    %c0_4 = arith.constant 0 : index
    %c0_5 = arith.constant 0 : index
    %5 = vector.load %arg8[%c0_4, %c0_5] : memref<16x128xf32, #tpu.memory_space<vmem>>, vector<16x128xf32>
    %cst = arith.constant dense<0.000000e+00> : vector<16x128xf32>
    %6 = tpu.matmul %3, %4, %cst {dimension_numbers = #tpu.dot_dimension_numbers<[1], [0], [0], [1], [0, 0, 1, 1], [], []>} : vector<16x128xf32>, vector<128x128xf32>, vector<16x128xf32> -> vector<16x128xf32>
    %7 = arith.addf %5, %6 : vector<16x128xf32>
    %c0_6 = arith.constant 0 : index
    %c0_7 = arith.constant 0 : index
    %8 = vector.load %arg8[%c0_6, %c0_7] : memref<16x128xf32, #tpu.memory_space<vmem>>, vector<16x128xf32>
    tpu.vector_store %arg8[%c0_6, %c0_7], %7 {strides = array<i32>} : memref<16x128xf32, #tpu.memory_space<vmem>>, vector<16x128xf32>,
    %c0_8 = arith.constant 0 : index
    %c0_9 = arith.constant 0 : index
    %9 = vector.load %arg9[%c0_8, %c0_9] : memref<1x128xf32, #tpu.memory_space<vmem>>, vector<1x128xf32>
    %c0_10 = arith.constant 0 : index
    %c0_11 = arith.constant 0 : index
    %10 = vector.load %arg3[%c0_10, %c0_11] : memref<1x128xf32, #tpu.memory_space<vmem>>, vector<1x128xf32>
    %cst_12 = arith.constant dense<0.000000e+00> : vector<1x128xf32>
    %11 = tpu.matmul %10, %4, %cst_12 {dimension_numbers = #tpu.dot_dimension_numbers<[1], [0], [0], [1], [0, 0, 1, 1], [], []>} : vector<1x128xf32>, vector<128x128xf32>, vector<1x128xf32> -> vector<1x128xf32>
    %12 = arith.addf %9, %11 : vector<1x128xf32>
    %c0_13 = arith.constant 0 : index
    %c0_14 = arith.constant 0 : index
    %13 = vector.load %arg9[%c0_13, %c0_14] : memref<1x128xf32, #tpu.memory_space<vmem>>, vector<1x128xf32>
    tpu.vector_store %arg9[%c0_13, %c0_14], %12 {strides = array<i32>} : memref<1x128xf32, #tpu.memory_space<vmem>>, vector<1x128xf32>,
    %c0_i32_15 = arith.constant 0 : i32
    %14 = arith.cmpi eq, %arg1, %c0_i32_15 : i32
    %15 = arith.extui %14 : i1 to i32
    %c0_i32_16 = arith.constant 0 : i32
    %16 = arith.cmpi ne, %15, %c0_i32_16 : i32
    scf.if %16 {
      %c0_17 = arith.constant 0 : index
      %c0_18 = arith.constant 0 : index
      %17 = vector.load %arg5[%c0_17, %c0_18] : memref<1x128xf32, #tpu.memory_space<vmem>>, vector<1x128xf32>
      %c0_19 = arith.constant 0 : index
      %c0_20 = arith.constant 0 : index
      %18 = vector.load %arg8[%c0_19, %c0_20] : memref<16x128xf32, #tpu.memory_space<vmem>>, vector<16x128xf32>
      %19 = vector.broadcast %17 : vector<1x128xf32> to vector<16x128xf32>
      %20 = arith.addf %18, %19 : vector<16x128xf32>
      %c0_21 = arith.constant 0 : index
      %c0_22 = arith.constant 0 : index
      %21 = vector.load %arg9[%c0_21, %c0_22] : memref<1x128xf32, #tpu.memory_space<vmem>>, vector<1x128xf32>
      %cst_23 = arith.constant 6.250000e-02 : f32
      %22 = vector.broadcast %cst_23 : f32 to vector<1x128xf32>
      %23 = arith.mulf %21, %22 : vector<1x128xf32>
      %24 = arith.addf %23, %17 : vector<1x128xf32>
      %25 = vector.broadcast %24 : vector<1x128xf32> to vector<16x128xf32>
      %26 = arith.subf %20, %25 : vector<16x128xf32>
      %27 = arith.mulf %26, %26 : vector<16x128xf32>
      %cst_24 = arith.constant dense<0.000000e+00> : vector<128xf32>
      %28 = vector.multi_reduction <add>, %27, %cst_24 [0] : vector<16x128xf32> to vector<128xf32>
      %29 = vector.shape_cast %28 : vector<128xf32> to vector<1x128xf32>
      %cst_25 = arith.constant 6.250000e-02 : f32
      %30 = vector.broadcast %cst_25 : f32 to vector<1x128xf32>
      %31 = arith.mulf %29, %30 : vector<1x128xf32>
      %cst_26 = arith.constant 9.99999974E-6 : f32
      %32 = vector.broadcast %cst_26 : f32 to vector<1x128xf32>
      %33 = arith.addf %31, %32 : vector<1x128xf32>
      %34 = math.rsqrt %33 : vector<1x128xf32>
      %35 = vector.broadcast %34 : vector<1x128xf32> to vector<16x128xf32>
      %36 = arith.mulf %26, %35 : vector<16x128xf32>
      %c0_27 = arith.constant 0 : index
      %c0_28 = arith.constant 0 : index
      %37 = vector.load %arg6[%c0_27, %c0_28] : memref<1x128xf32, #tpu.memory_space<vmem>>, vector<1x128xf32>
      %38 = vector.broadcast %37 : vector<1x128xf32> to vector<16x128xf32>
      %39 = arith.mulf %38, %36 : vector<16x128xf32>
      %c0_29 = arith.constant 0 : index
      %c0_30 = arith.constant 0 : index
      %40 = vector.load %arg7[%c0_29, %c0_30] : memref<1x128xf32, #tpu.memory_space<vmem>>, vector<1x128xf32>
      %41 = vector.broadcast %40 : vector<1x128xf32> to vector<16x128xf32>
      %42 = arith.addf %39, %41 : vector<16x128xf32>
      %cst_31 = arith.constant 0.000000e+00 : f32
      %43 = vector.broadcast %cst_31 : f32 to vector<16x128xf32>
      %44 = arith.maximumf %42, %43 : vector<16x128xf32>
      %c0_32 = arith.constant 0 : index
      %c0_33 = arith.constant 0 : index
      %45 = vector.load %arg8[%c0_32, %c0_33] : memref<16x128xf32, #tpu.memory_space<vmem>>, vector<16x128xf32>
      tpu.vector_store %arg8[%c0_32, %c0_33], %44 {strides = array<i32>} : memref<16x128xf32, #tpu.memory_space<vmem>>, vector<16x128xf32>,
    } else {
    }
    return
  }
  func.func @transform_0(%arg0: i32, %arg1: i32) -> (i32, i32) {
    %c0_i32 = arith.constant 0 : i32
    %c0_i32_0 = arith.constant 0 : i32
    return %c0_i32, %arg1 : i32, i32
  }
  func.func @transform_1(%arg0: i32, %arg1: i32) -> (i32, i32) {
    %c0_i32 = arith.constant 0 : i32
    %c0_i32_0 = arith.constant 0 : i32
    return %c0_i32, %arg1 : i32, i32
  }
  func.func @transform_2(%arg0: i32, %arg1: i32) -> (i32, i32) {
    %c0_i32 = arith.constant 0 : i32
    return %arg1, %arg0 : i32, i32
  }
  func.func @transform_3(%arg0: i32, %arg1: i32) -> (i32, i32) {
    %c0_i32 = arith.constant 0 : i32
    %c0_i32_0 = arith.constant 0 : i32
    return %c0_i32, %arg0 : i32, i32
  }
  func.func @transform_4(%arg0: i32, %arg1: i32) -> (i32, i32) {
    %c0_i32 = arith.constant 0 : i32
    %c0_i32_0 = arith.constant 0 : i32
    return %c0_i32, %arg0 : i32, i32
  }
  func.func @transform_5(%arg0: i32, %arg1: i32) -> (i32, i32) {
    %c0_i32 = arith.constant 0 : i32
    %c0_i32_0 = arith.constant 0 : i32
    return %c0_i32, %arg0 : i32, i32
  }
  func.func @transform_6(%arg0: i32, %arg1: i32) -> (i32, i32) {
    %c0_i32 = arith.constant 0 : i32
    %c0_i32_0 = arith.constant 0 : i32
    return %c0_i32, %arg0 : i32, i32
  }
}

</mosaic_0001>

<bundles_post_ra>
// kernel: tpu_custom_call.1
= control target key start
LH: loop header
LB: loop body
LE: loop exit
PB: predicated region body
PF: predicated region fallthrough
CT: control target
= control target key end

     0   :  { %11 = vsyncpa [#allocation4], 0  ;;  %s430_s0 = inlined_call_operand.hbm [shape: f32[16,128], index: 0, kind: input, shape index: {}]   ;;  %s431_s1 = inlined_call_operand.hbm [shape: f32[1,128], index: 1, kind: input, shape index: {}]   ;;  %s432_s2 = inlined_call_operand.hbm [shape: f32[128,128], index: 2, kind: input, shape index: {}]   ;;  %s433_s3 = inlined_call_operand.vmem [shape: f32[1,128], index: 3, kind: input, shape index: {}]   ;;  %s434_s4 = inlined_call_operand.vmem [shape: f32[1,128], index: 4, kind: input, shape index: {}]   ;;  %s435_s5 = inlined_call_operand.vmem [shape: f32[1,128], index: 5, kind: input, shape index: {}]   ;;  %s436_s6 = inlined_call_operand.hbm [shape: f32[16,128], index: 6, kind: output, shape index: {}]  }
   0x1   :  { %12 = vsyncpa [#allocation7], 0  ;;  %s32_s23 = sshll.u32 %s431_s1, 4  ;;  %s33_s23 = int_to_ptr.hbm [resolvable:$true] %s32_s23 }
   0x2   :  { %13 = vsyncpa [#allocation5], 0  ;;  %s355_s24 = smov [#allocation6]   ;;  %s18_s28 = sshll.u32 %s430_s0, 4  ;;  %s19_s28 = int_to_ptr.hbm [resolvable:$true] %s18_s28 }
   0x3   :  { %s34_s25 = sshll.u32 %s355_s24, 4  ;;  %s356_s29 = smov [#allocation3]   ;;  %s35_s25 = int_to_ptr.vmem [resolvable:$true] %s34_s25 }
   0x4   :  { %37 = dma.hbm_to_vmem [thread:$0]  %s33_s23, 16, %s35_s25, [#allocation7]  }
   0x5   :  { %s20_s30 = sshll.u32 %s356_s29, 4  ;;  %s357_s7 = smov 128   ;;  %s21_s30 = int_to_ptr.vmem [resolvable:$true] %s20_s30 }
   0x6   :  { %s358_s8 = smov 8   ;;  %s42_s10 = sshll.u32 %s432_s2, 4  ;;  %s43_s10 = int_to_ptr.hbm [resolvable:$true] %s42_s10 }
   0x7   :  { %26 = dma.hbm_to_vmem [thread:$0]  %s19_s28, 256, %s21_s30, [#allocation4], %s357_s7, %s357_s7, %s358_s8  }
   0x8   :  { %s359_s11 = smov [#allocation8]  }
   0x9   :  { %s44_s12 = sshll.u32 %s359_s11, 4  ;;  %s45_s12 = int_to_ptr.vmem [resolvable:$true] %s44_s12 }
   0xa   :  { %50 = dma.hbm_to_vmem [thread:$0]  %s43_s10, 2048, %s45_s12, [#allocation7], %s357_s7, %s357_s7, %s358_s8  }
   0xb   :  { %349 = dma.done.wait [#allocation4], 256  }
   0xc   :  { %350 = vsyncadd [#allocation4], 4294967040 }
   0xd   :  { %351 = dma.done.wait [#allocation7], 2064  }
   0xe   :  { %352 = vsyncadd [#allocation7], 4294965232  ;;  %v93_v0 = vld [vmem:[#allocation8 + $0x78] sm:$0xff]  ;;  %v92_v1 = vld [vmem:[#allocation8 + $0x70] sm:$0xff]  ;;  %v360_v3 = vmov 0.0   ;;  %s361_s18 = smov [#allocation9]  }
   0xf   :  { %225 = vmatpush.msra.mxu2 %v93_v0  ;;  %125 = vmatpush.msra.mxu1 %v93_v0  ;;  %v91_v2 = vld [vmem:[#allocation8 + $0x68] sm:$0xff]  ;;  %75 = vst [vmem:[#allocation2] sm:$0x1] %v360_v3  ;;  %v90_v4 = vld [vmem:[#allocation8 + $0x60] sm:$0xff]  ;;  %v89_v5 = vld [vmem:[#allocation8 + $0x58] sm:$0xff]  ;;  %s209_s19 = sshll.u32 %s361_s18, 4  ;;  %s210_s19 = int_to_ptr.vmem [resolvable:$true] %s209_s19 }
  0x10   :  { %96 = vmatpush.msra.mxu0 %v93_v0  ;;  %v88_v6 = vld [vmem:[#allocation8 + $0x50] sm:$0xff]  ;;  %v87_v7 = vld [vmem:[#allocation8 + $0x48] sm:$0xff]  ;;  %v86_v8 = vld [vmem:[#allocation8 + $0x40] sm:$0xff]  ;;  %s211_s22 = sshll.u32 %s436_s6, 4  ;;  %s212_s22 = int_to_ptr.hbm [resolvable:$true] %s211_s22 }
  0x11   :  { %226 = vmatpush.msra.mxu2 %v92_v1  ;;  %126 = vmatpush.msra.mxu1 %v92_v1  ;;  %v85_v9 = vld [vmem:[#allocation8 + $0x38] sm:$0xff]  ;;  %v84_v10 = vld [vmem:[#allocation8 + $0x30] sm:$0xff]  ;;  %v83_v11 = vld [vmem:[#allocation8 + $0x28] sm:$0xff] }
  0x12   :  { %97 = vmatpush.msra.mxu0 %v92_v1  ;;  %v82_v12 = vld [vmem:[#allocation8 + $0x20] sm:$0xff]  ;;  %v81_v13 = vld [vmem:[#allocation8 + $0x18] sm:$0xff]  ;;  %v80_v14 = vld [vmem:[#allocation8 + $0x10] sm:$0xff] }
  0x13   :  { %227 = vmatpush.msra.mxu2 %v91_v2  ;;  %127 = vmatpush.msra.mxu1 %v91_v2  ;;  %v79_v15 = vld [vmem:[#allocation8 + $0x8] sm:$0xff]  ;;  %v78_v16 = vld [vmem:[#allocation8] sm:$0xff]  ;;  %v77_v17 = vld [vmem:[#allocation3 + $0x8] sm:$0xff] }
  0x14   :  { %98 = vmatpush.msra.mxu0 %v91_v2  ;;  %v124_v18 = vld [vmem:[#allocation6] sm:$0x1]  ;;  %v76_v19 = vld [vmem:[#allocation3] sm:$0xff]  ;;  %v248_v25 = vld [vmem:[%s433_s3] ss:$0 sm:$0xff] }
  0x15   :  { %228 = vmatpush.msra.mxu2 %v90_v4  ;;  %128 = vmatpush.msra.mxu1 %v90_v4  ;;  %v150_v26 = vld [vmem:[%s433_s3] sm:$0x1] }
  0x16   :  { %99 = vmatpush.msra.mxu0 %v90_v4  ;;  %v123_v20 = vld [vmem:[#allocation2] sm:$0x1] }
  0x17   :  { %229 = vmatpush.msra.mxu2 %v89_v5  ;;  %129 = vmatpush.msra.mxu1 %v89_v5  ;;  %v249_v52 = vld [vmem:[%s434_s4] ss:$0 sm:$0xff] }
  0x18   :  { %100 = vmatpush.msra.mxu0 %v89_v5  ;;  %v250_v56 = vld [vmem:[%s435_s5] ss:$0 sm:$0xff] }
  0x19   :  { %230 = vmatpush.msra.mxu2 %v88_v6  ;;  %130 = vmatpush.msra.mxu1 %v88_v6 }
  0x1a   :  { %101 = vmatpush.msra.mxu0 %v88_v6 }
  0x1b   :  { %231 = vmatpush.msra.mxu2 %v87_v7  ;;  %131 = vmatpush.msra.mxu1 %v87_v7 }
  0x1c   :  { %102 = vmatpush.msra.mxu0 %v87_v7 }
  0x1d   :  { %232 = vmatpush.msra.mxu2 %v86_v8  ;;  %132 = vmatpush.msra.mxu1 %v86_v8 }
  0x1e   :  { %103 = vmatpush.msra.mxu0 %v86_v8 }
  0x1f   :  { %233 = vmatpush.msra.mxu2 %v85_v9  ;;  %133 = vmatpush.msra.mxu1 %v85_v9 }
  0x20   :  { %104 = vmatpush.msra.mxu0 %v85_v9 }
  0x21   :  { %234 = vmatpush.msra.mxu2 %v84_v10  ;;  %134 = vmatpush.msra.mxu1 %v84_v10 }
  0x22   :  { %105 = vmatpush.msra.mxu0 %v84_v10 }
  0x23   :  { %235 = vmatpush.msra.mxu2 %v83_v11  ;;  %135 = vmatpush.msra.mxu1 %v83_v11 }
  0x24   :  { %106 = vmatpush.msra.mxu0 %v83_v11 }
  0x25   :  { %236 = vmatpush.msra.mxu2 %v82_v12  ;;  %136 = vmatpush.msra.mxu1 %v82_v12 }
  0x26   :  { %107 = vmatpush.msra.mxu0 %v82_v12 }
  0x27   :  { %237 = vmatpush.msra.mxu2 %v81_v13  ;;  %137 = vmatpush.msra.mxu1 %v81_v13 }
  0x28   :  { %108 = vmatpush.msra.mxu0 %v81_v13 }
  0x29   :  { %238 = vmatpush.msra.mxu2 %v80_v14  ;;  %138 = vmatpush.msra.mxu1 %v80_v14 }
  0x2a   :  { %109 = vmatpush.msra.mxu0 %v80_v14 }
  0x2b   :  { %239 = vmatpush.msra.mxu2 %v79_v15  ;;  %139 = vmatpush.msra.mxu1 %v79_v15 }
  0x2c   :  { %110 = vmatpush.msra.mxu0 %v79_v15 }
  0x2d   :  { %240 = vmatpush.msra.mxu2 %v78_v16  ;;  %140 = vmatpush.msra.mxu1 %v78_v16 }
  0x2e   :  { %115 = vmatmul.f32.vlgmr.msra.gmra.mxu2 %v77_v17  ;;  %141 = vmatmul.f32.vlgmr.msra.gmra.mxu1 %v124_v18 }
  0x2f   :  { %111 = vmatpush.msra.mxu0 %v78_v16 }
  0x30   :  { %112 = vmatmul.f32.vlgmr.msra.gmra.mxu0 %v76_v19 }
  0xab   :  { %v142_v21 = vpop.f32.mrf.mxu1 }
  0xac   :  { %v145_v22 = vadd.f32 %v142_v21, %v123_v20 }
  0xad   :  { %v113_v23 = vpop.f32.mrf.mxu0 }
  0xae   :  { %146 = vst [vmem:[#allocation2] sm:$0x1] %v145_v22  ;;  %v156_v29 = vadd.f32 %v248_v25, %v113_v23 }
  0xb1   :  { %v116_v24 = vpop.f32.mrf.mxu2 }
  0xb2   :  { %v157_v30 = vadd.f32 %v248_v25, %v116_v24 }
  0xb5   :  { %v158_v27 = vld [vmem:[#allocation2] sm:$0x1] }
  0xb6   :  { %v159_v28 = vmul.f32 0.0625, %v158_v27 }
  0xb8   :  { %v160_v31 = vadd.f32 %v159_v28, %v150_v26 }
  0xba   :  { %v162_v32 = vperm.slane %v160_v31, 0 }
  0xbc   :  { %v164_v33 = vsub.f32 %v156_v29, %v162_v32  ;;  %v165_v34 = vsub.f32 %v157_v30, %v162_v32 }
  0xbe   :  { %v166_v35 = vmul.f32 %v164_v33, %v164_v33  ;;  %v167_v36 = vmul.f32 %v165_v34, %v165_v34 }
  0xc0   :  { %v168_v37 = vadd.f32 %v167_v36, %v166_v35 }
  0xc2   :  { %v169_v38 = vrot.slane %v168_v37, 4 }
  0xc4   :  { %v170_v39 = vadd.f32 %v169_v38, %v168_v37 }
  0xc6   :  { %v171_v40 = vrot.slane %v170_v39, 2 }
  0xc8   :  { %v172_v41 = vadd.f32 %v171_v40, %v170_v39 }
  0xca   :  { %v173_v42 = vrot.slane %v172_v41, 1 }
  0xcc   :  { %v174_v43 = vadd.f32 %v173_v42, %v172_v41 }
  0xce   :  { %v175_v44 = vmul.f32 0.0625, %v174_v43 }
  0xd0   :  { %v176_v45 = vadd.f32 1e-05, %v175_v44 }
  0xd2   :  { %251 = vrsqrt.f32 %v176_v45  ;;  %vm183_vm1 = vweird.f32 %v176_v45 }
  0xd8   :  { %v252_v46 = vpop.eup %251 }
  0xd9   :  { %v178_v47 = vmul.f32 %v252_v46, %v176_v45  ;;  %vm184_vm0 = vweird.f32 %v252_v46 }
  0xda   :  { %vm185_vm2 = vmor %vm183_vm1, %vm184_vm0 }
  0xdb   :  { %v179_v48 = vmul.f32 %v252_v46, %v178_v47 }
  0xdd   :  { %v180_v49 = vmul.f32 0.5, %v179_v48 }
  0xdf   :  { %v181_v50 = vsub.f32 1.5, %v180_v49 }
  0xe1   :  { %v182_v51 = vmul.f32 %v252_v46, %v181_v50 }
  0xe3   :  { %v186_v53 = vsel %vm185_vm2, %v252_v46, %v182_v51 }
  0xe4   :  { %v187_v54 = vmul.f32 %v186_v53, %v164_v33  ;;  %v188_v55 = vmul.f32 %v186_v53, %v165_v34 }
  0xe6   :  { %v193_v57 = vmul.f32 %v249_v52, %v187_v54  ;;  %v194_v58 = vmul.f32 %v249_v52, %v188_v55 }
  0xe8   :  { %v199_v59 = vadd.f32 %v250_v56, %v193_v57  ;;  %v200_v60 = vadd.f32 %v250_v56, %v194_v58 }
  0xea   :  { %v201_v61 = vmax.f32 %v199_v59, 0.0  ;;  %v202_v62 = vmax.f32 %v200_v60, 0.0 }
  0xec   :  { %203 = vst [vmem:[#allocation9] sm:$0xff] %v201_v61 }
  0xed   :  { %204 = vst [vmem:[#allocation9 + $0x8] sm:$0xff] %v202_v62 }
  0xee   :  { %217 = dma.vmem_to_hbm [thread:$0]  %s210_s19, 256, %s212_s22, [#allocation5], %s357_s7, %s357_s7, %s358_s8  }
  0xef   :  { %353 = dma.done.wait [#allocation5], 256  }
  0xf0   :  { %354 = vsyncadd [#allocation5], 4294967040 }
  0xf1   :  { %222 = vsyncpa [#allocation4], 1 }
  0xf2   :  { %223 = vsyncpa [#allocation7], 1 }
  0xf3   :  { %224 = vsyncpa [#allocation5], 1 }

</bundles_post_ra>
